<compile_context>
chip_gen: v7x
topology: tpu7x:2x2x1
jax: 0.10.0
libtpu: 0.0.40
codegen_flags: <defaults>
</compile_context>

<pallas_src>
import functools

import jax
import jax.numpy as jnp
from jax.experimental import pallas as pl
from jax.experimental.pallas import tpu as pltpu


def make_divisible(v, divisor=8, min_value=None):
    min_value = min_value or divisor
    new_v = max(min_value, int(v + divisor / 2) // divisor * divisor)
    if new_v < 0.9 * v:
        new_v += divisor
    return new_v


def _se_kernel(x_ref, w1_ref, b1_ref, w2_ref, b2_ref, o_ref, *,
               inv_hw, use_mxu, spatial_on_lanes):
    """One grid step owns TN full samples.

    spatial_on_lanes=True : x_ref/o_ref are (TN, C, HW)
    spatial_on_lanes=False: x_ref/o_ref are (TN, HW, C)
    w1_ref: (C, Cr); b1_ref: (1, Cr); w2_ref: (Cr, C); b2_ref: (1, C)
    """
    x = x_ref[...]                                    # native dtype; no f32 copy
    pool_axis = 2 if spatial_on_lanes else 1

    # Global average pool (AdaptiveAvgPool2d(1)) with f32 accumulation.
    pooled = jnp.sum(x.astype(jnp.float32), axis=pool_axis) * inv_hw   # (TN, C)

    # conv_reduce (1x1 conv on a 1x1 map == FC) + bias + ReLU
    if use_mxu:
        h = jnp.dot(pooled, w1_ref[...], preferred_element_type=jnp.float32)
    else:
        # tiny C/Cr: VPU broadcast-multiply + sublane reduce, skip MXU latency
        h = jnp.sum(pooled[:, :, None] * w1_ref[...][None, :, :], axis=1)
    h = jnp.maximum(h + b1_ref[...], 0.0)             # (TN, Cr)

    # conv_expand + bias + sigmoid gate
    if use_mxu:
        g = jnp.dot(h, w2_ref[...], preferred_element_type=jnp.float32)
    else:
        g = jnp.sum(h[:, :, None] * w2_ref[...][None, :, :], axis=1)
    g = jax.nn.sigmoid(g + b2_ref[...])               # (TN, C)

    g = g.astype(x.dtype)                             # gate multiply in native dtype
    if spatial_on_lanes:
        o_ref[...] = (x * g[:, :, None]).astype(o_ref.dtype)
    else:
        o_ref[...] = (x * g[:, None, :]).astype(o_ref.dtype)


def _pick_tn(n, per_sample_bytes, target_tile_bytes=4 << 20):
    """Largest divisor of n whose tile fits the budget, keeping >= 2 grid steps."""
    tn = max(1, target_tile_bytes // max(1, per_sample_bytes))
    if n >= 2:
        tn = min(tn, n // 2)      # grid length >= 2: pipelining + v7x megacore
    tn = int(max(1, min(tn, n)))
    while n % tn:                 # even tiling; no ragged last block
        tn -= 1
    return tn


def squeeze_excite_pallas(x_nchw, w_reduce, b_reduce, w_expand, b_expand):
    """x_nchw: (N, C, H, W); conv weights in PyTorch (out, in, 1, 1) layout."""
    N, C, H, W = x_nchw.shape
    Cr = w_reduce.shape[0]
    HW = H * W
    itemsize = x_nchw.dtype.itemsize

    # Lane-dense output layout choice.
    spatial_on_lanes = (HW % 128 == 0) or (C % 128 != 0)

    TN = _pick_tn(N, C * HW * itemsize)

    if spatial_on_lanes:
        x = x_nchw.reshape(N, C, HW)                       # (N, C, HW), HW on lanes
        xspec = pl.BlockSpec((TN, C, HW), lambda n: (n, 0, 0))
    else:
        x = x_nchw.reshape(N, C, HW).transpose(0, 2, 1)    # (N, HW, C), C on lanes
        xspec = pl.BlockSpec((TN, HW, C), lambda n: (n, 0, 0))

    # Pre-transpose weights so the FC is (TN,C)@(C,Cr) then (TN,Cr)@(Cr,C);
    # keep params in f32 (tiny) so FC math is f32 regardless of activation dtype.
    w1 = w_reduce.reshape(Cr, C).T.astype(jnp.float32)     # (C, Cr)
    b1 = b_reduce.reshape(1, Cr).astype(jnp.float32)
    w2 = w_expand.reshape(C, Cr).T.astype(jnp.float32)     # (Cr, C)
    b2 = b_expand.reshape(1, C).astype(jnp.float32)

    use_mxu = (C >= 128) and (Cr >= 32) and (TN >= 8)

    # ~2x double-buffered input + 2x output tiles + weights + small temps.
    tile_bytes = TN * C * HW * itemsize
    w_bytes = 4 * (w1.size + b1.size + w2.size + b2.size)
    vmem_limit = max(32 << 20, 5 * tile_bytes + 2 * w_bytes + (2 << 20))
    vmem_limit = int(min(vmem_limit, 56 << 20))            # < v7x 64 MiB / TC

    kernel = functools.partial(
        _se_kernel,
        inv_hw=1.0 / float(HW),
        use_mxu=use_mxu,
        spatial_on_lanes=spatial_on_lanes,
    )

    out = pl.pallas_call(
        kernel,
        out_shape=jax.ShapeDtypeStruct(x.shape, x.dtype),
        grid_spec=pltpu.PrefetchScalarGridSpec(
            num_scalar_prefetch=0,
            grid=(N // TN,),
            in_specs=[
                xspec,
                pl.BlockSpec((C, Cr), lambda n: (0, 0)),
                pl.BlockSpec((1, Cr), lambda n: (0, 0)),
                pl.BlockSpec((Cr, C), lambda n: (0, 0)),
                pl.BlockSpec((1, C), lambda n: (0, 0)),
            ],
            out_specs=xspec,
        ),
        compiler_params=pltpu.CompilerParams(
            dimension_semantics=("parallel",),
            vmem_limit_bytes=vmem_limit,
        ),
        # NOTE: input_output_aliases={0: 0} would let the gated result overwrite
        # x in HBM (halves the activation footprint); left off here so the
        # caller-side x stays usable.
    )(x, w1, b1, w2, b2)

    if spatial_on_lanes:
        return out.reshape(N, C, H, W)
    return out.transpose(0, 2, 1).reshape(N, C, H, W)


def squeeze_excite_ref(x, w_reduce, b_reduce, w_expand, b_expand):
    """Pure-JAX reference mirroring the PyTorch forward."""
    pooled = jnp.mean(x, axis=(2, 3), keepdims=True)              # (N,C,1,1)
    h = jnp.einsum('nchw,rc->nrhw', pooled, w_reduce[:, :, 0, 0]) \
        + b_reduce[None, :, None, None]
    h = jnp.maximum(h, 0.0)
    g = jnp.einsum('nrhw,cr->nchw', h, w_expand[:, :, 0, 0]) \
        + b_expand[None, :, None, None]
    g = jax.nn.sigmoid(g)
    return x * g


if __name__ == "__main__":
    key = jax.random.PRNGKey(0)
    N, C, H, W = 2, 4, 16, 16
    se_ratio, divisor = 0.25, 1
    Cr = make_divisible(C * se_ratio, divisor)    # = 1 for C=4

    k_x, k_w1, k_b1, k_w2, k_b2 = jax.random.split(key, 5)
    x = jax.random.normal(k_x, (N, C, H, W), dtype=jnp.float32)
    # Conv weights in PyTorch (out, in, 1, 1) layout.
    w_reduce = 0.3 * jax.random.normal(k_w1, (Cr, C, 1, 1), dtype=jnp.float32)
    b_reduce = 0.1 * jax.random.normal(k_b1, (Cr,), dtype=jnp.float32)
    w_expand = 0.3 * jax.random.normal(k_w2, (C, Cr, 1, 1), dtype=jnp.float32)
    b_expand = 0.1 * jax.random.normal(k_b2, (C,), dtype=jnp.float32)

    out = squeeze_excite_pallas(x, w_reduce, b_reduce, w_expand, b_expand)
    out = jax.block_until_ready(out)

    ref = squeeze_excite_ref(x, w_reduce, b_reduce, w_expand, b_expand)
    assert out.shape == (N, C, H, W)
    assert jnp.allclose(out, ref, atol=1e-5, rtol=1e-5), "mismatch vs reference"

    print("KERNEL_OK")
</pallas_src>

<mosaic_0001>
module attributes {stable_mosaic.version = 11 : i64} {
  func.func @_se_kernel(%arg0: i32, %arg1: memref<1x4x256xf32, #tpu.memory_space<vmem>>, %arg2: memref<4x1xf32, #tpu.memory_space<vmem>>, %arg3: memref<1x1xf32, #tpu.memory_space<vmem>>, %arg4: memref<1x4xf32, #tpu.memory_space<vmem>>, %arg5: memref<1x4xf32, #tpu.memory_space<vmem>>, %arg6: memref<1x4x256xf32, #tpu.memory_space<vmem>>) attributes {dimension_semantics = [#tpu.dimension_semantics<parallel>], iteration_bounds = array<i64: 2>, scalar_prefetch = 0 : i64, scratch_operands = 0 : i64, tpu.core_type = #tpu.core_type<tc>, window_params = [{transform_indices = @transform_0, window_bounds = array<i64: 1, 4, 256>}, {pipeline_mode = #tpu.pipeline_mode<synchronous>, transform_indices = @transform_1, window_bounds = array<i64: 4, 1>}, {pipeline_mode = #tpu.pipeline_mode<synchronous>, transform_indices = @transform_2, window_bounds = array<i64: 1, 1>}, {pipeline_mode = #tpu.pipeline_mode<synchronous>, transform_indices = @transform_3, window_bounds = array<i64: 1, 4>}, {pipeline_mode = #tpu.pipeline_mode<synchronous>, transform_indices = @transform_4, window_bounds = array<i64: 1, 4>}, {transform_indices = @transform_5, window_bounds = array<i64: 1, 4, 256>}]} {
    %c0 = arith.constant 0 : index
    %c0_0 = arith.constant 0 : index
    %c0_1 = arith.constant 0 : index
    %0 = vector.load %arg1[%c0, %c0_0, %c0_1] : memref<1x4x256xf32, #tpu.memory_space<vmem>>, vector<1x4x256xf32>
    %cst = arith.constant dense<0.000000e+00> : vector<1x4xf32>
    %1 = vector.multi_reduction <add>, %0, %cst [2] : vector<1x4x256xf32> to vector<1x4xf32>
    %cst_2 = arith.constant 3.906250e-03 : f32
    %2 = vector.broadcast %cst_2 : f32 to vector<1x4xf32>
    %3 = arith.mulf %1, %2 : vector<1x4xf32>
    %4 = vector.shape_cast %3 : vector<1x4xf32> to vector<1x4x1xf32>
    %c0_3 = arith.constant 0 : index
    %c0_4 = arith.constant 0 : index
    %5 = vector.load %arg2[%c0_3, %c0_4] : memref<4x1xf32, #tpu.memory_space<vmem>>, vector<4x1xf32>
    %6 = vector.shape_cast %5 : vector<4x1xf32> to vector<1x4x1xf32>
    %7 = arith.mulf %4, %6 : vector<1x4x1xf32>
    %cst_5 = arith.constant dense<0.000000e+00> : vector<1x1xf32>
    %8 = vector.multi_reduction <add>, %7, %cst_5 [1] : vector<1x4x1xf32> to vector<1x1xf32>
    %c0_6 = arith.constant 0 : index
    %c0_7 = arith.constant 0 : index
    %9 = vector.load %arg3[%c0_6, %c0_7] : memref<1x1xf32, #tpu.memory_space<vmem>>, vector<1x1xf32>
    %10 = arith.addf %8, %9 : vector<1x1xf32>
    %cst_8 = arith.constant 0.000000e+00 : f32
    %11 = vector.broadcast %cst_8 : f32 to vector<1x1xf32>
    %12 = arith.maximumf %10, %11 : vector<1x1xf32>
    %13 = vector.shape_cast %12 : vector<1x1xf32> to vector<1x1x1xf32>
    %c0_9 = arith.constant 0 : index
    %c0_10 = arith.constant 0 : index
    %14 = vector.load %arg4[%c0_9, %c0_10] : memref<1x4xf32, #tpu.memory_space<vmem>>, vector<1x4xf32>
    %15 = vector.shape_cast %14 : vector<1x4xf32> to vector<1x1x4xf32>
    %16 = vector.broadcast %13 : vector<1x1x1xf32> to vector<1x1x4xf32>
    %17 = arith.mulf %16, %15 : vector<1x1x4xf32>
    %cst_11 = arith.constant dense<0.000000e+00> : vector<1x4xf32>
    %18 = vector.multi_reduction <add>, %17, %cst_11 [1] : vector<1x1x4xf32> to vector<1x4xf32>
    %c0_12 = arith.constant 0 : index
    %c0_13 = arith.constant 0 : index
    %19 = vector.load %arg5[%c0_12, %c0_13] : memref<1x4xf32, #tpu.memory_space<vmem>>, vector<1x4xf32>
    %20 = arith.addf %18, %19 : vector<1x4xf32>
    %21 = arith.negf %20 : vector<1x4xf32>
    %22 = math.exp %21 : vector<1x4xf32>
    %cst_14 = arith.constant 1.000000e+00 : f32
    %23 = vector.broadcast %cst_14 : f32 to vector<1x4xf32>
    %24 = arith.addf %23, %22 : vector<1x4xf32>
    %25 = arith.divf %23, %24 : vector<1x4xf32>
    %26 = vector.shape_cast %25 : vector<1x4xf32> to vector<1x4x1xf32>
    %27 = vector.broadcast %26 : vector<1x4x1xf32> to vector<1x4x256xf32>
    %28 = arith.mulf %0, %27 : vector<1x4x256xf32>
    %c0_15 = arith.constant 0 : index
    %c0_16 = arith.constant 0 : index
    %c0_17 = arith.constant 0 : index
    %29 = vector.load %arg6[%c0_15, %c0_16, %c0_17] : memref<1x4x256xf32, #tpu.memory_space<vmem>>, vector<1x4x256xf32>
    tpu.vector_store %arg6[%c0_15, %c0_16, %c0_17], %28 {strides = array<i32>} : memref<1x4x256xf32, #tpu.memory_space<vmem>>, vector<1x4x256xf32>,
    return
  }
  func.func @transform_0(%arg0: i32) -> (i32, i32, i32) {
    %c0_i32 = arith.constant 0 : i32
    %c0_i32_0 = arith.constant 0 : i32
    %c0_i32_1 = arith.constant 0 : i32
    return %arg0, %c0_i32, %c0_i32_0 : i32, i32, i32
  }
  func.func @transform_1(%arg0: i32) -> (i32, i32) {
    %c0_i32 = arith.constant 0 : i32
    %c0_i32_0 = arith.constant 0 : i32
    %c0_i32_1 = arith.constant 0 : i32
    return %c0_i32, %c0_i32_0 : i32, i32
  }
  func.func @transform_2(%arg0: i32) -> (i32, i32) {
    %c0_i32 = arith.constant 0 : i32
    %c0_i32_0 = arith.constant 0 : i32
    %c0_i32_1 = arith.constant 0 : i32
    return %c0_i32, %c0_i32_0 : i32, i32
  }
  func.func @transform_3(%arg0: i32) -> (i32, i32) {
    %c0_i32 = arith.constant 0 : i32
    %c0_i32_0 = arith.constant 0 : i32
    %c0_i32_1 = arith.constant 0 : i32
    return %c0_i32, %c0_i32_0 : i32, i32
  }
  func.func @transform_4(%arg0: i32) -> (i32, i32) {
    %c0_i32 = arith.constant 0 : i32
    %c0_i32_0 = arith.constant 0 : i32
    %c0_i32_1 = arith.constant 0 : i32
    return %c0_i32, %c0_i32_0 : i32, i32
  }
  func.func @transform_5(%arg0: i32) -> (i32, i32, i32) {
    %c0_i32 = arith.constant 0 : i32
    %c0_i32_0 = arith.constant 0 : i32
    %c0_i32_1 = arith.constant 0 : i32
    return %arg0, %c0_i32, %c0_i32_0 : i32, i32, i32
  }
}

</mosaic_0001>

<bundles_post_ra>
// kernel: tpu_custom_call.1
= control target key start
LH: loop header
LB: loop body
LE: loop exit
PB: predicated region body
PF: predicated region fallthrough
CT: control target
= control target key end

     0   :  { %s766_s0 = inlined_call_operand.hbm [shape: f32[2,4,256], index: 0, kind: input, shape index: {}]   ;;  %s767_s1 = inlined_call_operand.vmem [shape: f32[4,1], index: 1, kind: input, shape index: {}]   ;;  %s768_s2 = inlined_call_operand.<no memory space> [shape: f32[1,1], index: 2, kind: input, shape index: {}]   ;;  %s769_s3 = inlined_call_operand.vmem [shape: f32[1,4], index: 3, kind: input, shape index: {}]   ;;  %s770_s4 = inlined_call_operand.vmem [shape: f32[1,4], index: 4, kind: input, shape index: {}]   ;;  %s771_s5 = inlined_call_operand.hbm [shape: f32[2,4,256], index: 5, kind: output, shape index: {}]  }
   0x1   :  { %v10_v0 = vstv %s768_s2 }
   0x2   :  { %11 = vst [vmem:[#allocation2] sm:$0x1] %v10_v0 }
   0x3   :  { %12 = vsyncpa [#allocation4], 0 }
   0x4   :  { %14 = vsyncpa [#allocation4 + $0x1], 0 }
   0x5   :  { %15 = vsyncpa [#allocation5], 0 }
   0x6   :  { %17 = vsyncpa [#allocation5 + $0x1], 0  ;;  %s592_s20 = smov 0   ;;  %s594_s21 = smov 0  }
   0x7   :  { %s596_s22 = smov 0   ;;  %s598_s23 = smov 0  }
   0x8 LB: > { %s613_s2 = sadd.s32 4294967295, %s553_s23   ;;  %s386_s24 = sadd.s32 4294967294, %s553_s23   ;;  %s553_s23 = sphi %s598_s23, %s786_s23   ;;  %s549_s22 = sphi %s596_s22, %s785_s22   ;;  %s545_s21 = sphi %s594_s21, %s784_s21   ;;  %s541_s20 = sphi %s592_s20, %s783_s20  }
   0x9   : > { %s617_s25 = sadd.s32 1, %s553_s23   ;;  %s30_s26 = sadd.s32 1, %s549_s22 }
   0xa   : > { %s27_s27 = ssub.s32 %s553_s23, %s617_s25  ;;  %p37_p0 = scmp.ne.s32.totalorder %s549_s22, %s545_s21 }
   0xb   : > { %p28_p1 = scmp.eq.s32.totalorder %s27_s27, 0  ;;  %p38_p2 = scmp.eq.s32.totalorder %s553_s23, 0 }
   0xc   : > { %p43_p3 = scmp.ne.s32.totalorder %s545_s21, %s541_s20  ;;  %p44_p4 = scmp.eq.s32.totalorder %s613_s2, 0 }
   0xd   : > { %s629_s28 = scalar_select %p28_p1, %s549_s22, %s30_s26  }
   0xe   : > { %p631_p5 = por %p38_p2, %p37_p0  ;;  %p635_p6 = por %p44_p4, %p43_p3 }
   0xf   : > { %p151_p7 = scmp.eq.s32.totalorder %s613_s2, 1  ;;  %p157_p8 = scmp.eq.s32.totalorder %s386_s24, 1 }
  0x10   : > { %p415_p10 = scmp.lt.s32.totalorder %s553_s23, 2  ;;  %s189_s8 = sand.u32 1, %s549_s22  }
  0x11   : > { %p642_p11 = por %p151_p7, %p37_p0  ;;  %p646_p12 = por %p157_p8, %p43_p3 }
  0x12   : > { %s401_s9 = sshll.u32 %s553_s23, 7  ;;  %s389_s10 = sshll.u32 %s189_s8, 3 }
  0x13   : > { %s775_s6 = scalar_select %p642_p11, 1, 0 }
  0x14   : > { %s776_s7 = scalar_select %p646_p12, 1, 0 }
  0x15   : > { %s655_s13 = scalar_lea.hbm %s766_s0, %s401_s9  ;;  %s193_s14 = scalar_lea.vmem [#allocation3], %s389_s10 }
  0x16   : > { %s201_s15 = sshll.u32 %s193_s14, 4  ;;  %p659_p13 = pnand %p415_p10, %p631_p5  ;;  %s663_s15 = int_to_ptr.vmem [resolvable:$true] %s201_s15 }
  0x17   : > { %s190_s17 = scalar_lea.sflag [#allocation4], %s189_s8  ;;  %s457_s18 = scalar_lea.hbm %s655_s13, 128 }
  0x18   : > { %p458_p2 = scmp.ne.s32.totalorder %s655_s13, %s457_s18  ;;  %p459_p3 = pneg %p659_p13 }
  0x19   : > { %s462_s26 = scalar_lea.hbm %s766_s0, 256  ;;  %p463_p5 = scmp.lt.u32.totalorder %s655_s13, %s766_s0 }
  0x1a   : > { %p460_p4 = pnand %p459_p3, %p458_p2  ;;  %p464_p8 = scmp.lt.u32.totalorder %s462_s26, %s457_s18 }
  0x1b   : > { %p466_p9 = scmp.lt.u32.totalorder %s457_s18, %s655_s13 }
  0x1c   : > { %p461_p7 = pneg %p460_p4  ;;  %p465_p10 = por %p464_p8, %p463_p5 }
  0x1e   : > { %p467_p0 = por %p466_p9, %p465_p10 }
  0x20   : > { %p468_p1 = pnand %p467_p0, %p461_p7 }
  0x22   : > { %471 = shalt.err (!%p468_p1)
}
  0x23   : > { %s472_s8 = scalar_lea.vmem %s663_s15, 128  ;;  %s555_s9 = smov [#allocation3]  }
  0x24   : > { %p473_p2 = scmp.ne.s32.totalorder %s663_s15, %s472_s8  ;;  %s477_s10 = sshll.u32 %s555_s9, 4  ;;  %s478_s10 = int_to_ptr.vmem [resolvable:$false] %s477_s10 }
  0x25   : > { %s479_s11 = scalar_lea.vmem %s478_s10, 256  ;;  %p480_p11 = scmp.lt.s32.totalorder %s663_s15, %s478_s10 }
  0x26   : > { %p475_p4 = pnand %p473_p2, %p459_p3  ;;  %p481_p5 = scmp.lt.s32.totalorder %s479_s11, %s472_s8 }
  0x28   : > { %p476_p12 = pneg %p475_p4  ;;  %p482_p8 = por %p481_p5, %p480_p11 }
  0x2a   : > { %p483_p9 = pnand %p482_p8, %p476_p12 }
  0x2c   : > { %486 = shalt.err (!%p483_p9)
}
  0x2d   : > { %410 = dma.hbm_to_vmem [thread:$0]  (!%p659_p13), %s655_s13, 128, %s663_s15, %s190_s17  }
  0x2e   : > { %p778_p0 = scmp.lt.s32.totalorder %s553_s23, 3  ;;  %p779_p1 = scmp.ge.s32.totalorder %s553_s23, 1 }
  0x30   : > { %p207_p3 = pnand %p779_p1, %p778_p0 }
  0x31   : > { %s697_s12 = sand.u32 (!%p207_p3), 1, %s545_s21  }
  0x32   : > { %210 = sbr.rel (%p207_p3) target bundleno = 520 (0x208), region = 40  ;;  %s393_s14 = sshll.u32 (!%p207_p3), %s697_s12, 3 }
  0x33   : > { %s213_s18 = scalar_lea.sflag (!%p207_p3), [#allocation4], %s697_s12  ;;  %s216_s16 = scalar_lea.vmem (!%p207_p3), [#allocation3], %s393_s14 }
  0x39   : > { %532 = dma.done.wait (%p635_p6), %s213_s18, 128  }
  0x3a   : > { %534 = vsyncadd (%p635_p6), %s213_s18, 4294967168  ;;  %vm247_vm0 = vcmask 1043456   ;;  %v243_v1 = vld [vmem:[%s216_s16] sm:$0xff]  ;;  %v556_v6 = vmov 0   ;;  %vm256_vm1 = vcmask 3072   ;;  %v283_v29 = vlaneseq  ;;  %s402_s26 = sshll.u32 %s613_s2, 7 }
  0x3b   : > { %v245_v2 = vcombine.high %v243_v1, %v243_v1  ;;  %v248_v3 = vsel %vm247_vm0, %v243_v1, 0.0  ;;  %451 = vset.pattern.permute.xlu0 %v556_v6  ;;  %v254_v7 = vld [vmem:[%s767_s1] sm:$0xf]  ;;  %v557_v34 = vmov 839922192   ;;  %s242_s27 = scalar_lea.vmem [#allocation6], %s393_s14  ;;  %s722_s10 = scalar_lea.hbm %s771_s5, %s402_s26 }
  0x3c   : > { %v264_v17 = vld [vmem:[#allocation2] sm:$0x1]  ;;  %v284_v30 = vshrl.u32 %v283_v29, 7  ;;  %v292_v35 = vunpack.c.l.s4 %v557_v34  ;;  %s316_s29 = sshll.u32 %s242_s27, 4  ;;  %s302_s11 = scalar_lea.sflag [#allocation5], %s697_s12  ;;  %s724_s29 = int_to_ptr.vmem [resolvable:$true] %s316_s29 }
  0x3d   : > { %v249_v4 = vsel %vm247_vm0, %v245_v2, 0.0  ;;  %v267_v21 = vld [vmem:[%s769_s3] sm:$0x1]  ;;  %s487_s18 = scalar_lea.vmem %s724_s29, 128  ;;  %p780_p11 = scmp.ne.s32.totalorder %s775_s6, 0 }
  0x3e   : > { %v250_v5 = vadd.f32 %v249_v4, %v248_v3  ;;  %v275_v22 = vld [vmem:[%s770_s4] sm:$0x1]  ;;  %v285_v31 = vsub.s32 0, %v284_v30  ;;  %v293_v36 = vunpack.c.0.s8 %v292_v35  ;;  %p488_p6 = scmp.ne.s32.totalorder %s724_s29, %s487_s18  ;;  %s558_s2 = smov [#allocation6]  }
  0x3f   : > { %s491_s14 = sshll.u32 %s558_s2, 4  ;;  %s492_s14 = int_to_ptr.vmem [resolvable:$false] %s491_s14 }
  0x40   : > { %251 = vadd.xlane.f32.xlu0 %v250_v5  ;;  %v296_v37 = vsub.s32 %v293_v36, %v284_v30  ;;  %p489_p12 = pnand %p488_p6, %p780_p11  ;;  %s493_s16 = scalar_lea.vmem %s492_s14, 256 }
  0x41   : > { %p494_p7 = scmp.lt.s32.totalorder %s724_s29, %s492_s14  ;;  %p495_p10 = scmp.lt.s32.totalorder %s493_s16, %s487_s18 }
  0x42   : > { %p490_p13 = pneg %p489_p12 }
  0x43   : > { %p496_p2 = por %p495_p10, %p494_p7 }
  0x45   : > { %p497_p4 = pnand %p496_p2, %p490_p13 }
  0xcd   : > { %v252_v8 = vpop.xlane.xlu0 %251 }
  0xce   : > { %v253_v9 = vmul.f32 0.00390625, %v252_v8 }
  0xd0   : > { %v255_v10 = vmul.f32 %v254_v7, %v253_v9 }
  0xd2   : > { %v257_v11 = vsel %vm256_vm1, %v255_v10, 0.0 }
  0xd3   : > { %v258_v12 = vrot.slane %v257_v11, 4 }
  0xd5   : > { %v259_v13 = vadd.f32 %v258_v12, %v257_v11 }
  0xd7   : > { %v260_v14 = vrot.slane %v259_v13, 2 }
  0xd9   : > { %v261_v15 = vadd.f32 %v260_v14, %v259_v13 }
  0xdb   : > { %v262_v16 = vrot.slane %v261_v15, 1 }
  0xdd   : > { %v263_v18 = vadd.f32 %v262_v16, %v261_v15 }
  0xdf   : > { %v265_v19 = vadd.f32 %v264_v17, %v263_v18 }
  0xe1   : > { %v266_v20 = vmax.f32 %v265_v19, 0.0 }
  0xe3   : > { %270 = vperm.xlu0 %451, %v266_v20  }
 0x162   : > { %v271_v23 = vpop.permute.xlu0 %270 }
 0x163   : > { %v273_v24 = vmul.f32 %v271_v23, %v267_v21 }
 0x165   : > { %v276_v25 = vadd.f32 %v275_v22, %v273_v24 }
 0x167   : > { %v395_v26 = vmul.f32 -1.442695, %v276_v25 }
 0x169   : > { %453 = vpow2.f32 %v395_v26 }
 0x173   : > { %v454_v27 = vpop.eup %453 }
 0x174   : > { %v280_v28 = vadd.f32 1.0, %v454_v27 }
 0x176   : > { %455 = vrcp.f32 %v280_v28 }
 0x180   : > { %v456_v32 = vpop.eup %455 }
 0x181   : > { %v286_v33 = vrot.slane %v456_v32, %v285_v31 }
 0x183   : > { %288 = vbcast.lane.b32.xlu1 %v286_v33, 256 }
 0x1f5   : > { %v289_v38 = vpop.permute.xlu1 %288 }
 0x1f6   : > { %v297_v39 = vrot.slane %v289_v38, %v296_v37 }
 0x1f8   : > { %v299_v40 = vmul.f32 %v297_v39, %v243_v1 }
 0x1fa   : > { %300 = vst [vmem:[%s242_s27] sm:$0xff] %v299_v40 }
 0x1fb   : > { %500 = shalt.err (!%p497_p4)
}
 0x1fc   : > { %s501_s12 = scalar_lea.hbm %s722_s10, 128  ;;  %s505_s30 = scalar_lea.hbm %s771_s5, 256 }
 0x1fd   : > { %p502_p5 = scmp.ne.s32.totalorder %s722_s10, %s501_s12  ;;  %p506_p0 = scmp.lt.u32.totalorder %s722_s10, %s771_s5 }
 0x1fe   : > { %p507_p1 = scmp.lt.u32.totalorder %s505_s30, %s501_s12  ;;  %p509_p6 = scmp.lt.u32.totalorder %s501_s12, %s722_s10 }
 0x1ff   : > { %p503_p8 = pnand %p502_p5, %p780_p11 }
 0x200   : > { %p508_p3 = por %p507_p1, %p506_p0 }
 0x201   : > { %p504_p9 = pneg %p503_p8 }
 0x202   : > { %p510_p12 = por %p509_p6, %p508_p3 }
 0x204   : > { %p511_p13 = pnand %p510_p12, %p504_p9 }
 0x206   : > { %514 = shalt.err (!%p511_p13)
}
 0x207   : > { %405 = dma.vmem_to_hbm [thread:$0]  (%p780_p11), %s724_s29, 128, %s722_s10, %s302_s11  }
 0x208 PF: > { %s328_s24 = sand.u32 1, %s541_s20   ;;  %p781_p7 = scmp.ne.s32.totalorder %s776_s7, 0 }
 0x209   : > { %p782_p10 = scmp.ge.s32.totalorder %s553_s23, 2  ;;  %s329_s26 = scalar_lea.sflag [#allocation5], %s328_s24 }
 0x20b   : > { %p412_p2 = pnand %p782_p10, %p781_p7 }
 0x20d   : > { %536 = dma.done.wait (!%p412_p2), %s329_s26, 128  }
 0x20e   : > { %538 = vsyncadd (!%p412_p2), %s329_s26, 4294967168  ;;  %p20_p4 = scmp.ge.s32.totalorder %s617_s25, 4   ;;  %s783_s20 = smov %s545_s21 }
 0x20f   : > { %s784_s21 = smov %s549_s22  ;;  %s785_s22 = smov %s629_s28 }
 0x210   : > { %s786_s23 = smov %s617_s25  ;;  %22 = sbr.rel (!%p20_p4) target bundleno = 8 (0x8), region = 85 }
 0x217   :  { %334 = vsyncpa [#allocation4], 1 }
 0x218   :  { %336 = vsyncpa [#allocation4 + $0x1], 1 }
 0x219   :  { %337 = vsyncpa [#allocation5], 1 }
 0x21a   :  { %339 = vsyncpa [#allocation5 + $0x1], 1 }

</bundles_post_ra>
